<compile_context>
chip_gen: v6e
topology: v6e:2x2x1
jax: 0.10.0
libtpu: 0.0.40
codegen_flags: <defaults>
</compile_context>

<pallas_src>
import numpy as np
import jax
import jax.numpy as jnp
from jax.experimental import pallas as pl
from jax.experimental.pallas import tpu as pltpu


def conv_module_kernel(cols1_ref, w1_ref, b1_ref, w2_ref, b2_ref,
                       wf_ref, bf_ref, out_ref):
    f32 = jnp.float32
    n_batch = out_ref.shape[0]
    c_mid = w1_ref.shape[1]                       # 32
    k2 = w2_ref.shape[0] // c_mid                 # 5
    l1 = cols1_ref.shape[0] // (2 * n_batch)      # pool1 output length (5)
    t2 = 3                                        # conv2 rows consumed by final k=3 pool

    # ---- conv1 + ReLU: ONE K=3 MXU matmul over both pool-window operand slabs.
    #      Rows are ordered (pool window i, batch n); slab A then slab B. -------
    h1 = jnp.dot(cols1_ref[...], w1_ref[...], preferred_element_type=f32)
    h1 = jnp.maximum(h1 + b1_ref[...], 0.0)                       # (2*L1*N, 32)

    # ---- maxpool1d(k=2, s=2, pad=1): one VPU max, no selector matmuls ---------
    half = l1 * n_batch
    p1 = jnp.maximum(h1[:half, :], h1[half:, :])                  # (L1*N, 32), (i, n) order

    # ---- conv2 zero padding: one zero time-block on each side -----------------
    zpad = jnp.zeros((n_batch, c_mid), f32)
    p1p = jnp.concatenate([zpad, p1, zpad], axis=0)               # ((L1+2)*N, 32)

    # ---- conv2 + ReLU: 5 accumulated K=32 MXU matmuls; time-major layout makes
    #      every tap a contiguous static slice of p1p (no gathers, no 160-lane
    #      concat). ------------------------------------------------------------
    acc = jnp.dot(p1p[:t2 * n_batch, :], w2_ref[:c_mid, :],
                  preferred_element_type=f32)
    for k in range(1, k2):
        tap = p1p[k * n_batch:(k + t2) * n_batch, :]              # (3*N, 32)
        acc = acc + jnp.dot(tap, w2_ref[k * c_mid:(k + 1) * c_mid, :],
                            preferred_element_type=f32)
    h2 = jnp.maximum(acc + b2_ref[...], 0.0)                      # (3*N, 64), (t, n) order

    # ---- maxpool1d(k=3, s=3): two VPU maxima over contiguous row blocks -------
    p2 = jnp.maximum(jnp.maximum(h2[:n_batch, :],
                                 h2[n_batch:2 * n_batch, :]),
                     h2[2 * n_batch:3 * n_batch, :])              # (N, 64)

    # ---- squeeze + fc1 + fc2 (folded host-side into one 64 -> 1 projection) ---
    out = jnp.sum(p2 * wf_ref[...], axis=-1, keepdims=True) + bf_ref[...]
    # TODO(synk): lane-dense (1, N) store for large batch; irrelevant at N=2.
    out_ref[...] = out.astype(out_ref.dtype)                      # (N, 1)


def conv_module_forward(x_ncl, params):
    """x_ncl: (N, 1, L) float32.  params in PyTorch layouts."""
    w1, b1, w2, b2, fw1, fb1, fw2, fb2 = params
    N, c_in, L = x_ncl.shape
    assert c_in == 1
    K1, K2 = int(w1.shape[2]), int(w2.shape[2])          # 3, 5
    c_mid, c_out = int(w1.shape[0]), int(w2.shape[0])    # 32, 64
    L1 = (L + 2 - 2) // 2 + 1                            # pool1 length (k=2,s=2,p=1)
    L2 = L1 + 2 - K2 + 1                                 # conv2 length (pad=1)
    T2 = 3                                               # rows read by final pool
    # squeeze() + Linear(64, 32) require the final pooled length to be 1.
    assert L2 >= T2 and (L2 - 3) // 3 + 1 == 1, "final pooled length must be 1"

    # ---- host-side prep: pure layout (im2col / transposes) + exact fc fold ----
    x2d = x_ncl[:, 0, :].astype(jnp.float32)             # (N, L)
    xp = jnp.pad(x2d, ((0, 0), (1, 1)))                  # conv1 zero padding, (N, L+2)

    # Pool1 operand times, clamped into range (valid: every window has >= 1
    # in-range element and conv1 outputs are post-ReLU nonnegative).
    t_a = np.clip(2 * np.arange(L1) - 1, 0, L - 1)       # first element of each window
    t_b = np.clip(2 * np.arange(L1), 0, L - 1)           # second element of each window

    def im2col(times):
        # rows ordered (pool window i, batch n): row i*N+n = xp[n, t_i : t_i+K1]
        return jnp.concatenate([xp[:, int(t):int(t) + K1] for t in times], axis=0)

    cols1 = jnp.concatenate([im2col(t_a), im2col(t_b)], axis=0)   # (2*L1*N, 3)

    w1_mat = jnp.transpose(w1, (2, 1, 0))[:, 0, :]                # (3, 32)  (k, c_out)
    w2_mat = jnp.transpose(w2, (2, 1, 0)).reshape(K2 * c_mid, c_out)  # (160, 64), tap-major

    # fc1 -> fc2 has no activation in between (matches the spec module): exact fold.
    wf = jnp.dot(fw2, fw1, precision=jax.lax.Precision.HIGHEST)           # (1, 64)
    bf = (jnp.dot(fw2, fb1, precision=jax.lax.Precision.HIGHEST)
          + fb2).reshape(1, 1)                                            # (1, 1)

    args = (cols1, w1_mat, b1.reshape(1, -1), w2_mat, b2.reshape(1, -1), wf, bf)

    # Whole problem is a few KiB: one gridless, fully VMEM-resident invocation.
    # TODO(synk): for large N, grid over batch (dimension_semantics=("parallel",))
    #             so v7x's 2 TensorCores split the work; keep gridless on v5e/v6e.
    return pl.pallas_call(
        conv_module_kernel,
        out_shape=jax.ShapeDtypeStruct((N, 1), jnp.float32),
        in_specs=[pl.BlockSpec(memory_space=pltpu.MemorySpace.VMEM)] * len(args),
        out_specs=pl.BlockSpec(memory_space=pltpu.MemorySpace.VMEM),
    )(*args)


def reference_forward(x_ncl, params):
    """Pure-JAX reference replicating the PyTorch forward exactly."""
    w1, b1, w2, b2, fw1, fb1, fw2, fb2 = params
    dn = ('NCH', 'OIH', 'NCH')
    h = jax.lax.conv_general_dilated(x_ncl, w1, (1,), [(1, 1)], dimension_numbers=dn)
    h = jax.nn.relu(h + b1[None, :, None])
    h = jax.lax.reduce_window(h, -jnp.inf, jax.lax.max, (1, 1, 2), (1, 1, 2),
                              [(0, 0), (0, 0), (1, 1)])
    h = jax.lax.conv_general_dilated(h, w2, (1,), [(1, 1)], dimension_numbers=dn)
    h = jax.nn.relu(h + b2[None, :, None])
    h = jax.lax.reduce_window(h, -jnp.inf, jax.lax.max, (1, 1, 3), (1, 1, 3),
                              [(0, 0), (0, 0), (0, 0)])
    h = h[:, :, 0]                                       # .squeeze() -> (N, 64)
    h = h @ fw1.T + fb1
    h = h @ fw2.T + fb2
    return h


if __name__ == "__main__":
    key = jax.random.PRNGKey(0)
    ks = jax.random.split(key, 9)
    N, L = 2, 8                                          # X: (2, 1, 8)
    x = jax.random.normal(ks[0], (N, 1, L), dtype=jnp.float32)

    # Deterministic synthetic parameters (PyTorch shapes).
    params = (
        0.3 * jax.random.normal(ks[1], (32, 1, 3), jnp.float32),   # conv1.weight
        0.1 * jax.random.normal(ks[2], (32,), jnp.float32),        # conv1.bias
        0.1 * jax.random.normal(ks[3], (64, 32, 5), jnp.float32),  # conv2.weight
        0.1 * jax.random.normal(ks[4], (64,), jnp.float32),        # conv2.bias
        0.1 * jax.random.normal(ks[5], (32, 64), jnp.float32),     # fc1.weight
        0.1 * jax.random.normal(ks[6], (32,), jnp.float32),        # fc1.bias
        0.1 * jax.random.normal(ks[7], (1, 32), jnp.float32),      # fc2.weight
        0.1 * jax.random.normal(ks[8], (1,), jnp.float32),         # fc2.bias
    )

    out = jax.block_until_ready(conv_module_forward(x, params))
    ref = jax.block_until_ready(reference_forward(x, params))
    assert out.shape == (N, 1)
    np.testing.assert_allclose(np.asarray(out), np.asarray(ref), rtol=1e-5, atol=1e-5)
    print("KERNEL_OK")
</pallas_src>

<mosaic_0001>
module attributes {stable_mosaic.version = 11 : i64} {
  func.func @conv_module_kernel(%arg0: memref<20x3xf32, #tpu.memory_space<vmem>>, %arg1: memref<3x32xf32, #tpu.memory_space<vmem>>, %arg2: memref<1x32xf32, #tpu.memory_space<vmem>>, %arg3: memref<160x64xf32, #tpu.memory_space<vmem>>, %arg4: memref<1x64xf32, #tpu.memory_space<vmem>>, %arg5: memref<1x64xf32, #tpu.memory_space<vmem>>, %arg6: memref<1x1xf32, #tpu.memory_space<vmem>>, %arg7: memref<2x1xf32, #tpu.memory_space<vmem>>) attributes {dimension_semantics = [], scalar_prefetch = 0 : i64, scratch_operands = 0 : i64, tpu.core_type = #tpu.core_type<tc>} {
    %c0 = arith.constant 0 : index
    %c0_0 = arith.constant 0 : index
    %0 = vector.load %arg0[%c0, %c0_0] : memref<20x3xf32, #tpu.memory_space<vmem>>, vector<20x3xf32>
    %c0_1 = arith.constant 0 : index
    %c0_2 = arith.constant 0 : index
    %1 = vector.load %arg1[%c0_1, %c0_2] : memref<3x32xf32, #tpu.memory_space<vmem>>, vector<3x32xf32>
    %cst = arith.constant dense<0.000000e+00> : vector<20x32xf32>
    %2 = tpu.matmul %0, %1, %cst {dimension_numbers = #tpu.dot_dimension_numbers<[1], [0], [0], [1], [0, 0, 1, 1], [], []>} : vector<20x3xf32>, vector<3x32xf32>, vector<20x32xf32> -> vector<20x32xf32>
    %c0_3 = arith.constant 0 : index
    %c0_4 = arith.constant 0 : index
    %3 = vector.load %arg2[%c0_3, %c0_4] : memref<1x32xf32, #tpu.memory_space<vmem>>, vector<1x32xf32>
    %4 = vector.broadcast %3 : vector<1x32xf32> to vector<20x32xf32>
    %5 = arith.addf %2, %4 : vector<20x32xf32>
    %cst_5 = arith.constant 0.000000e+00 : f32
    %6 = vector.broadcast %cst_5 : f32 to vector<20x32xf32>
    %7 = arith.maximumf %5, %6 : vector<20x32xf32>
    %8 = vector.extract_strided_slice %7 {offsets = [0, 0], sizes = [10, 32], strides = [1, 1]} : vector<20x32xf32> to vector<10x32xf32>
    %9 = vector.extract_strided_slice %7 {offsets = [10, 0], sizes = [10, 32], strides = [1, 1]} : vector<20x32xf32> to vector<10x32xf32>
    %10 = arith.maximumf %8, %9 : vector<10x32xf32>
    %cst_6 = arith.constant 0.000000e+00 : f32
    %11 = vector.broadcast %cst_6 : f32 to vector<2x32xf32>
    %12 = tpu.concatenate %11, %10, %11 in 0 : vector<2x32xf32>, vector<10x32xf32>, vector<2x32xf32> -> vector<14x32xf32>
    %13 = vector.extract_strided_slice %12 {offsets = [0, 0], sizes = [6, 32], strides = [1, 1]} : vector<14x32xf32> to vector<6x32xf32>
    %c0_7 = arith.constant 0 : index
    %c0_8 = arith.constant 0 : index
    %14 = vector.load %arg3[%c0_7, %c0_8] : memref<160x64xf32, #tpu.memory_space<vmem>>, vector<32x64xf32>
    %cst_9 = arith.constant dense<0.000000e+00> : vector<6x64xf32>
    %15 = tpu.matmul %13, %14, %cst_9 {dimension_numbers = #tpu.dot_dimension_numbers<[1], [0], [0], [1], [0, 0, 1, 1], [], []>} : vector<6x32xf32>, vector<32x64xf32>, vector<6x64xf32> -> vector<6x64xf32>
    %16 = vector.extract_strided_slice %12 {offsets = [2, 0], sizes = [6, 32], strides = [1, 1]} : vector<14x32xf32> to vector<6x32xf32>
    %c32 = arith.constant 32 : index
    %c0_10 = arith.constant 0 : index
    %17 = vector.load %arg3[%c32, %c0_10] : memref<160x64xf32, #tpu.memory_space<vmem>>, vector<32x64xf32>
    %cst_11 = arith.constant dense<0.000000e+00> : vector<6x64xf32>
    %18 = tpu.matmul %16, %17, %cst_11 {dimension_numbers = #tpu.dot_dimension_numbers<[1], [0], [0], [1], [0, 0, 1, 1], [], []>} : vector<6x32xf32>, vector<32x64xf32>, vector<6x64xf32> -> vector<6x64xf32>
    %19 = arith.addf %15, %18 : vector<6x64xf32>
    %20 = vector.extract_strided_slice %12 {offsets = [4, 0], sizes = [6, 32], strides = [1, 1]} : vector<14x32xf32> to vector<6x32xf32>
    %c64 = arith.constant 64 : index
    %c0_12 = arith.constant 0 : index
    %21 = vector.load %arg3[%c64, %c0_12] : memref<160x64xf32, #tpu.memory_space<vmem>>, vector<32x64xf32>
    %cst_13 = arith.constant dense<0.000000e+00> : vector<6x64xf32>
    %22 = tpu.matmul %20, %21, %cst_13 {dimension_numbers = #tpu.dot_dimension_numbers<[1], [0], [0], [1], [0, 0, 1, 1], [], []>} : vector<6x32xf32>, vector<32x64xf32>, vector<6x64xf32> -> vector<6x64xf32>
    %23 = arith.addf %19, %22 : vector<6x64xf32>
    %24 = vector.extract_strided_slice %12 {offsets = [6, 0], sizes = [6, 32], strides = [1, 1]} : vector<14x32xf32> to vector<6x32xf32>
    %c96 = arith.constant 96 : index
    %c0_14 = arith.constant 0 : index
    %25 = vector.load %arg3[%c96, %c0_14] : memref<160x64xf32, #tpu.memory_space<vmem>>, vector<32x64xf32>
    %cst_15 = arith.constant dense<0.000000e+00> : vector<6x64xf32>
    %26 = tpu.matmul %24, %25, %cst_15 {dimension_numbers = #tpu.dot_dimension_numbers<[1], [0], [0], [1], [0, 0, 1, 1], [], []>} : vector<6x32xf32>, vector<32x64xf32>, vector<6x64xf32> -> vector<6x64xf32>
    %27 = arith.addf %23, %26 : vector<6x64xf32>
    %28 = vector.extract_strided_slice %12 {offsets = [8, 0], sizes = [6, 32], strides = [1, 1]} : vector<14x32xf32> to vector<6x32xf32>
    %c128 = arith.constant 128 : index
    %c0_16 = arith.constant 0 : index
    %29 = vector.load %arg3[%c128, %c0_16] : memref<160x64xf32, #tpu.memory_space<vmem>>, vector<32x64xf32>
    %cst_17 = arith.constant dense<0.000000e+00> : vector<6x64xf32>
    %30 = tpu.matmul %28, %29, %cst_17 {dimension_numbers = #tpu.dot_dimension_numbers<[1], [0], [0], [1], [0, 0, 1, 1], [], []>} : vector<6x32xf32>, vector<32x64xf32>, vector<6x64xf32> -> vector<6x64xf32>
    %31 = arith.addf %27, %30 : vector<6x64xf32>
    %c0_18 = arith.constant 0 : index
    %c0_19 = arith.constant 0 : index
    %32 = vector.load %arg4[%c0_18, %c0_19] : memref<1x64xf32, #tpu.memory_space<vmem>>, vector<1x64xf32>
    %33 = vector.broadcast %32 : vector<1x64xf32> to vector<6x64xf32>
    %34 = arith.addf %31, %33 : vector<6x64xf32>
    %cst_20 = arith.constant 0.000000e+00 : f32
    %35 = vector.broadcast %cst_20 : f32 to vector<6x64xf32>
    %36 = arith.maximumf %34, %35 : vector<6x64xf32>
    %37 = vector.extract_strided_slice %36 {offsets = [0, 0], sizes = [2, 64], strides = [1, 1]} : vector<6x64xf32> to vector<2x64xf32>
    %38 = vector.extract_strided_slice %36 {offsets = [2, 0], sizes = [2, 64], strides = [1, 1]} : vector<6x64xf32> to vector<2x64xf32>
    %39 = arith.maximumf %37, %38 : vector<2x64xf32>
    %40 = vector.extract_strided_slice %36 {offsets = [4, 0], sizes = [2, 64], strides = [1, 1]} : vector<6x64xf32> to vector<2x64xf32>
    %41 = arith.maximumf %39, %40 : vector<2x64xf32>
    %c0_21 = arith.constant 0 : index
    %c0_22 = arith.constant 0 : index
    %42 = vector.load %arg5[%c0_21, %c0_22] : memref<1x64xf32, #tpu.memory_space<vmem>>, vector<1x64xf32>
    %43 = vector.broadcast %42 : vector<1x64xf32> to vector<2x64xf32>
    %44 = arith.mulf %41, %43 : vector<2x64xf32>
    %cst_23 = arith.constant dense<0.000000e+00> : vector<2xf32>
    %45 = vector.multi_reduction <add>, %44, %cst_23 [1] : vector<2x64xf32> to vector<2xf32>
    %46 = vector.shape_cast %45 : vector<2xf32> to vector<2x1xf32>
    %c0_24 = arith.constant 0 : index
    %c0_25 = arith.constant 0 : index
    %47 = vector.load %arg6[%c0_24, %c0_25] : memref<1x1xf32, #tpu.memory_space<vmem>>, vector<1x1xf32>
    %48 = vector.broadcast %47 : vector<1x1xf32> to vector<2x1xf32>
    %49 = arith.addf %46, %48 : vector<2x1xf32>
    %c0_26 = arith.constant 0 : index
    %c0_27 = arith.constant 0 : index
    %50 = vector.load %arg7[%c0_26, %c0_27] : memref<2x1xf32, #tpu.memory_space<vmem>>, vector<2x1xf32>
    tpu.vector_store %arg7[%c0_26, %c0_27], %49 {strides = array<i32>} : memref<2x1xf32, #tpu.memory_space<vmem>>, vector<2x1xf32>,
    return
  }
}

</mosaic_0001>

<bundles_post_ra>
// kernel: tpu_custom_call.1
= control target key start
LH: loop header
LB: loop body
LE: loop exit
PB: predicated region body
PF: predicated region fallthrough
CT: control target
= control target key end

     0   :  { %vm49_vm0 = vcmask 1042432   ;;  %vm39_vm1 = vcmask 23552   ;;  %v702_v0 = vmov 0.0   ;;  %vm703_vm2 = vmmov 0   ;;  %s881_s1 = inlined_call_operand.vmem [shape: f32[3,32], index: 1, kind: input, shape index: {}]   ;;  %s882_s0 = inlined_call_operand.vmem [shape: f32[20,3], index: 0, kind: input, shape index: {}]   ;;  %s883_s3 = inlined_call_operand.vmem [shape: f32[160,64], index: 3, kind: input, shape index: {}]   ;;  %s884_s2 = inlined_call_operand.vmem [shape: f32[1,32], index: 2, kind: input, shape index: {}]   ;;  %s885_s6 = inlined_call_operand.<no memory space> [shape: f32[1,1], index: 6, kind: input, shape index: {}]   ;;  %s886_s4 = inlined_call_operand.vmem [shape: f32[1,64], index: 4, kind: input, shape index: {}]   ;;  %s887_s5 = inlined_call_operand.vmem [shape: f32[1,64], index: 5, kind: input, shape index: {}]   ;;  %s888_s7 = inlined_call_operand.vmem [shape: f32[2,1], index: 7, kind: output, shape index: {}]  }
   0x1   :  { %634 = vmatprep.subr.mxu0 %v702_v0  ;;  %v31_v1 = vld [vmem:[%s881_s1] sm:$0x7]  ;;  %636 = vmatprep.mubr.msk.f32.mxu0 %vm703_vm2, %v702_v0  ;;  %v29_v3 = vld [vmem:[%s882_s0 + $0x8] sm:$0xff]  ;;  %v30_v4 = vld [vmem:[%s882_s0 + $0x10] sm:$0xf]  ;;  %vm138_vm3 = vcmask 1045504   ;;  %v12_v55 = vstv %s885_s6 }
   0x2   :  { %v28_v2 = vld [vmem:[%s882_s0] sm:$0xff]  ;;  %635 = vmatpush3.msk.msra.mxu0 %vm49_vm0, %v31_v1  ;;  %645 = vmatprep.subr.mxu1 %v702_v0  ;;  %v160_v5 = vld [vmem:[%s883_s3 + $0x18] sm:$0xff]  ;;  %v159_v7 = vld [vmem:[%s883_s3 + $0x10] sm:$0xff]  ;;  %vm148_vm4 = vcmask 1041408   ;;  %vm155_vm5 = vcmask 1043456   ;;  %vm167_vm6 = vcmask 261120  }
   0x3   :  { %637 = vmatmul.mubr.msk.f32.vlgmr.msra.gmra.mxu0 %vm39_vm1, %v28_v2  ;;  %656 = vmatprep.subr.mxu0 %v702_v0  ;;  %v164_v6 = vld [vmem:[%s883_s3 + $0x38] sm:$0xff]  ;;  %v163_v8 = vld [vmem:[%s883_s3 + $0x30] sm:$0xff]  ;;  %v158_v9 = vld [vmem:[%s883_s3 + $0x8] sm:$0xff]  ;;  %13 = vst [vmem:[#allocation2] sm:$0x1] %v12_v55  ;;  %vm574_vm7 = vcmask 517120  }
   0x4   :  { %639 = vmatprep.mubr.msk.f32.mxu0 %vm703_vm2, %v702_v0  ;;  %653 = vmatprep.mubr.msk.f32.mxu1 %vm703_vm2, %v702_v0  ;;  %v162_v10 = vld [vmem:[%s883_s3 + $0x28] sm:$0xff]  ;;  %v157_v11 = vld [vmem:[%s883_s3] sm:$0xff]  ;;  %v396_v33 = vld [vmem:[%s883_s3 + $0x78] sm:$0xff]  ;;  %vm586_vm8 = vcmask 1024  }
   0x5   :  { %657 = vmatpush3.msra.mxu0 %v160_v5  ;;  %646 = vmatpush3.msra.mxu1 %v164_v6  ;;  %v161_v12 = vld [vmem:[%s883_s3 + $0x20] sm:$0xff]  ;;  %v315_v38 = vld [vmem:[%s883_s3 + $0x58] sm:$0xff]  ;;  %v395_v39 = vld [vmem:[%s883_s3 + $0x70] sm:$0xff] }
   0x6   :  { %658 = vmatprep.subr.mxu0 %v702_v0  ;;  %647 = vmatprep.subr.mxu1 %v702_v0  ;;  %v592_v15 = vld [vmem:[%s884_s2] ss:$0 sm:$0xff]  ;;  %v314_v40 = vld [vmem:[%s883_s3 + $0x50] sm:$0xff]  ;;  %v394_v41 = vld [vmem:[%s883_s3 + $0x68] sm:$0xff] }
   0x7   :  { %640 = vmatmul.mubr.msk.f32.gmra.mxu0 %vm39_vm1, %v29_v3  ;;  %648 = vmatpush3.msra.mxu1 %v163_v8  ;;  %v313_v44 = vld [vmem:[%s883_s3 + $0x48] sm:$0xff]  ;;  %v393_v45 = vld [vmem:[%s883_s3 + $0x60] sm:$0xff]  ;;  %v476_v50 = vld [vmem:[%s883_s3 + $0x98] sm:$0xff] }
   0x8   :  { %642 = vmatprep.mubr.msk.f32.mxu0 %vm703_vm2, %v702_v0  ;;  %659 = vmatpush3.msra.mxu0 %v159_v7  ;;  %v312_v48 = vld [vmem:[%s883_s3 + $0x40] sm:$0xff]  ;;  %v475_v52 = vld [vmem:[%s883_s3 + $0x90] sm:$0xff]  ;;  %v474_v53 = vld [vmem:[%s883_s3 + $0x88] sm:$0xff] }
   0x9   :  { %660 = vmatprep.subr.mxu0 %v702_v0  ;;  %649 = vmatprep.subr.mxu1 %v702_v0  ;;  %v473_v54 = vld [vmem:[%s883_s3 + $0x80] sm:$0xff] }
   0xa   :  { %661 = vmatpush3.msra.mxu0 %v158_v9  ;;  %650 = vmatpush3.msra.mxu1 %v162_v10 }
   0xb   :  { %643 = vmatmul.mubr.msk.f32.gmra.mxu0 %vm39_vm1, %v30_v4  ;;  %662 = vmatprep.subr.mxu0 %v702_v0  ;;  %v602_v4 = vld [vmem:[%s886_s4] ss:$0 sm:$0xff] }
   0xc   :  { %664 = vmatprep.mubr.msk.f32.mxu0 %vm703_vm2, %v702_v0  ;;  %663 = vmatpush3.msra.mxu0 %v157_v11 }
   0xd   :  { %651 = vmatprep.subr.mxu1 %v702_v0  ;;  %678 = vmatprep.subr.mxu0 %v702_v0 }
   0xe   :  { %652 = vmatpush3.msra.mxu1 %v161_v12  ;;  %v603_v12 = vld [vmem:[%s887_s5] ss:$0 sm:$0xff] }
   0xf   :  { %667 = vmatprep.subr.mxu1 %v702_v0 }
  0xc3   :  { %v119_v13 = vpop.f32.mrf.mxu0 }
  0xc4   :  { %v120_v22 = vadd.f32 %v592_v15, %v119_v13 }
  0xc5   :  { %v638_v14 = vpop.f32.mrf.mxu0 }
  0xc6   :  { %v133_v27 = vmax.f32 %v120_v22, 0.0 }
  0xc7   :  { %v124_v16 = vpop.f32.mrf.mxu0 }
  0xc8   :  { %v125_v17 = vadd.f32 %v592_v15, %v124_v16  ;;  %v604_v16 = vld [vmem:[#allocation2] ss:$0 sm:$0xff] }
  0xc9   :  { %v641_v18 = vpop.f32.mrf.mxu0 }
  0xca   :  { %v134_v20 = vmax.f32 %v125_v17, 0.0 }
  0xcb   :  { %v129_v19 = vpop.f32.mrf.mxu0 }
  0xcc   :  { %v130_v21 = vadd.f32 %v592_v15, %v129_v19  ;;  %v139_v25 = vrot.slane %v134_v20, 2 }
  0xcd   :  { %v644_v23 = vpop.f32.mrf.mxu0 }
  0xce   :  { %v135_v24 = vmax.f32 %v130_v21, 0.0 }
  0xd0   :  { %v140_v26 = vrot.slane %v135_v24, 2 }
  0xd2   :  { %v141_v28 = vsel %vm138_vm3, %v139_v25, %v140_v26  ;;  %v145_v29 = vmax.f32 %v134_v20, %v140_v26 }
  0xd3   :  { %v144_v30 = vmax.f32 %v133_v27, %v141_v28 }
  0xd4   :  { %v150_v31 = vrot.slane %v145_v29, 6 }
  0xd5   :  { %v149_v32 = vrot.slane %v144_v30, 6 }
  0xd7   :  { %v151_v34 = vsel %vm148_vm4, %v149_v32, %v150_v31  ;;  %v154_v35 = vsel %vm148_vm4, 0.0, %v149_v32 }
  0xd8   :  { %v156_v36 = vsel %vm155_vm5, %v151_v34, 0.0  ;;  %665 = vmatmul.mubr.msk.f32.vlgmr.msra.gmra.mxu0 %vm167_vm6, %v154_v35  ;;  %v166_v37 = vrot.slane %v154_v35, 2  ;;  %v397_v42 = vrot.slane %v154_v35, 6  ;;  %v317_v46 = vrot.slane %v154_v35, 4 }
  0xd9   :  { %679 = vmatpush3.msra.mxu0 %v396_v33  ;;  %686 = vmatprep.mubr.msk.f32.mxu0 %vm703_vm2, %v702_v0  ;;  %v398_v43 = vrot.slane %v156_v36, 6  ;;  %v318_v47 = vrot.slane %v156_v36, 4 }
  0xda   :  { %680 = vmatprep.subr.mxu0 %v702_v0  ;;  %654 = vmatmul.mubr.msk.f32.vlgmr.msra.gmra.mxu1 %vm167_vm6, %v166_v37 }
  0xdb   :  { %668 = vmatpush3.msra.mxu1 %v315_v38  ;;  %681 = vmatpush3.msra.mxu0 %v395_v39  ;;  %v399_v49 = vsel %vm148_vm4, %v397_v42, %v398_v43  ;;  %v319_v51 = vsel %vm155_vm5, %v317_v46, %v318_v47 }
  0xdc   :  { %669 = vmatprep.subr.mxu1 %v702_v0  ;;  %682 = vmatprep.subr.mxu0 %v702_v0 }
  0xdd   :  { %670 = vmatpush3.msra.mxu1 %v314_v40  ;;  %683 = vmatpush3.msra.mxu0 %v394_v41 }
  0xde   :  { %671 = vmatprep.subr.mxu1 %v702_v0  ;;  %684 = vmatprep.subr.mxu0 %v702_v0 }
  0xdf   :  { %672 = vmatpush3.msra.mxu1 %v313_v44  ;;  %685 = vmatpush3.msra.mxu0 %v393_v45 }
  0xe0   :  { %673 = vmatprep.subr.mxu1 %v702_v0  ;;  %687 = vmatmul.mubr.msk.f32.vlgmr.msra.gmra.mxu0 %vm167_vm6, %v399_v49 }
  0xe1   :  { %674 = vmatpush3.msra.mxu1 %v312_v48  ;;  %675 = vmatprep.mubr.msk.f32.mxu1 %vm703_vm2, %v702_v0 }
  0xe2   :  { %676 = vmatmul.mubr.msk.f32.vlgmr.msra.gmra.mxu1 %vm167_vm6, %v319_v51  ;;  %689 = vmatprep.subr.mxu1 %v702_v0 }
  0xe3   :  { %690 = vmatpush3.msra.mxu1 %v476_v50  ;;  %697 = vmatprep.mubr.msk.f32.mxu1 %vm703_vm2, %v702_v0 }
  0xe4   :  { %691 = vmatprep.subr.mxu1 %v702_v0 }
  0xe5   :  { %692 = vmatpush3.msra.mxu1 %v475_v52 }
  0xe6   :  { %693 = vmatprep.subr.mxu1 %v702_v0 }
  0xe7   :  { %694 = vmatpush3.msra.mxu1 %v474_v53 }
  0xe8   :  { %695 = vmatprep.subr.mxu1 %v702_v0 }
  0xe9   :  { %696 = vmatpush3.msra.mxu1 %v473_v54 }
  0xea   :  { %698 = vmatmul.mubr.msk.f32.vlgmr.msra.gmra.mxu1 %vm167_vm6, %v156_v36 }
 0x198   :  { %v308_v56 = vpop.f32.mrf.mxu0 }
 0x19a   :  { %v236_v57 = vpop.f32.mrf.mxu1  ;;  %v666_v58 = vpop.f32.mrf.mxu0 }
 0x19b   :  { %v309_v63 = vadd.f32 %v308_v56, %v236_v57 }
 0x19c   :  { %v655_v59 = vpop.f32.mrf.mxu1 }
 0x1a0   :  { %v468_v60 = vpop.f32.mrf.mxu0 }
 0x1a2   :  { %v388_v61 = vpop.f32.mrf.mxu1  ;;  %v688_v62 = vpop.f32.mrf.mxu0 }
 0x1a3   :  { %v392_v2 = vadd.f32 %v388_v61, %v309_v63 }
 0x1a4   :  { %v677_v1 = vpop.f32.mrf.mxu1 }
 0x1a5   :  { %v472_v3 = vadd.f32 %v468_v60, %v392_v2 }
 0x1aa   :  { %v545_v0 = vpop.f32.mrf.mxu1 }
 0x1ab   :  { %v549_v5 = vadd.f32 %v545_v0, %v472_v3 }
 0x1ac   :  { %v699_v6 = vpop.f32.mrf.mxu1 }
 0x1ad   :  { %v557_v7 = vadd.f32 %v602_v4, %v549_v5 }
 0x1af   :  { %v558_v8 = vmax.f32 %v557_v7, 0.0 }
 0x1b1   :  { %v560_v9 = vrot.slane %v558_v8, 2  ;;  %v563_v11 = vrot.slane %v558_v8, 4 }
 0x1b3   :  { %v562_v10 = vmax.f32 %v558_v8, %v560_v9 }
 0x1b5   :  { %v565_v13 = vmax.f32 %v562_v10, %v563_v11 }
 0x1b7   :  { %v573_v14 = vmul.f32 %v603_v12, %v565_v13 }
 0x1b9   :  { %v575_v15 = vsel %vm574_vm7, %v573_v14, 0.0 }
 0x1ba   :  { %576 = vadd.xlane.f32.xlu0 %v575_v15 }
 0x243   :  { %v577_v17 = vpop.xlane.xlu0 %576 }
 0x244   :  { %v585_v18 = vadd.f32 %v604_v16, %v577_v17 }
 0x246   :  { %587 = vst.msk [vmem:[%s888_s7] sm:$0x3] %vm586_vm8, %v585_v18 }

</bundles_post_ra>
